<compile_context>
chip_gen: v7x
topology: tpu7x:2x2x1
jax: 0.10.0
libtpu: 0.0.40
codegen_flags: <defaults>
</compile_context>

<pallas_src>
import math
from functools import partial

import jax
import jax.numpy as jnp
from jax import lax
from jax.experimental import pallas as pl
from jax.experimental.pallas import tpu as pltpu


def _round_up(n, m):
    return ((n + m - 1) // m) * m


def _pad_to(arr, shape):
    pads = [(0, t - s) for s, t in zip(arr.shape, shape)]
    if any(p[1] for p in pads):
        return jnp.pad(arr, pads)
    return arr


def _ffc_kernel(x_ref, w1_ref, b1_ref, w2_ref, b2_ref, o_ref):
    # x_ref:  (tm, Kp)  bf16 tile of input rows
    # w1_ref: (Kp, Hp)  bf16 fc1 weight (transposed vs. PyTorch)
    # b1_ref: (1, Hp)   f32  fc1 bias
    # w2_ref: (Hp, Np)  bf16 fc2 weight (transposed vs. PyTorch)
    # b2_ref: (1, Np)   f32  fc2 bias
    # o_ref:  (tm, Np)  f32  output tile

    # fc1 (bf16 MXU path, f32 accumulation)
    h = jnp.dot(x_ref[...], w1_ref[...], preferred_element_type=jnp.float32)
    h = h + b1_ref[...]

    # exact (erf-based) GELU in f32, matching F.gelu default
    h = 0.5 * h * (1.0 + lax.erf(h * (1.0 / math.sqrt(2.0))))

    # dropout1 == identity (eval semantics)

    # fc2 (bf16 MXU path, f32 accumulation)
    out = jnp.dot(h.astype(jnp.bfloat16), w2_ref[...],
                  preferred_element_type=jnp.float32)
    out = out + b2_ref[...]

    # dropout2 == identity (eval semantics)
    o_ref[...] = out.astype(o_ref.dtype)


@partial(jax.jit, static_argnames=("tm",))
def vit_ffc_forward(x, w1, b1, w2, b2, *, tm=None):
    """x: (batch, seq, input_size) f32. w1: (K, H), w2: (H, N). Returns (batch, seq, N)."""
    B, S, K = x.shape
    H = w1.shape[1]
    N = w2.shape[1]
    M = B * S

    # Row tile: big enough to feed the MXU, but never larger than needed.
    if tm is None:
        tm = min(256, _round_up(M, 8))
    tm = max(8, _round_up(tm, 8))

    # Lane-dense feature dims and tile-aligned row count (zero padding is inert).
    Kp = _round_up(K, 128)
    Hp = _round_up(H, 128)
    Np = _round_up(N, 128)
    Mp = _round_up(M, tm)

    x2d = _pad_to(x.reshape(M, K), (Mp, Kp)).astype(jnp.bfloat16)
    w1p = _pad_to(w1, (Kp, Hp)).astype(jnp.bfloat16)
    w2p = _pad_to(w2, (Hp, Np)).astype(jnp.bfloat16)
    b1p = _pad_to(b1.reshape(1, H), (1, Hp)).astype(jnp.float32)
    b2p = _pad_to(b2.reshape(1, N), (1, Np)).astype(jnp.float32)

    grid_m = Mp // tm

    # Explicit VMEM budget: double-buffered x/out tiles + resident weights +
    # the f32 (tm, Hp) intermediate, with headroom. Clamped to sane limits.
    vmem_bytes = (
        2 * tm * Kp * 2        # x tile, bf16, double-buffered
        + 2 * Kp * Hp * 2      # w1, bf16
        + 2 * Hp * Np * 2      # w2, bf16
        + 2 * Hp * 4           # b1
        + 2 * Np * 4           # b2
        + 2 * tm * Np * 4      # out tile, f32, double-buffered
        + tm * Hp * 4          # GELU intermediate, f32
    )
    vmem_limit = int(min(max(2 * vmem_bytes + (16 << 20), 32 << 20), 100 << 20))

    cost = pl.CostEstimate(
        flops=2 * Mp * (Kp * Hp + Hp * Np),
        transcendentals=Mp * Hp,
        bytes_accessed=(Mp * Kp * 2 + Kp * Hp * 2 + Hp * Np * 2
                        + Hp * 4 + Np * 4 + Mp * Np * 4),
    )

    out2d = pl.pallas_call(
        _ffc_kernel,
        out_shape=jax.ShapeDtypeStruct((Mp, Np), jnp.float32),
        grid_spec=pltpu.PrefetchScalarGridSpec(
            num_scalar_prefetch=0,
            grid=(grid_m,),
            in_specs=[
                pl.BlockSpec((tm, Kp), lambda i: (i, 0)),   # x rows
                pl.BlockSpec((Kp, Hp), lambda i: (0, 0)),   # fc1 weight (resident)
                pl.BlockSpec((1, Hp), lambda i: (0, 0)),    # fc1 bias
                pl.BlockSpec((Hp, Np), lambda i: (0, 0)),   # fc2 weight (resident)
                pl.BlockSpec((1, Np), lambda i: (0, 0)),    # fc2 bias
            ],
            out_specs=pl.BlockSpec((tm, Np), lambda i: (i, 0)),
        ),
        compiler_params=pltpu.CompilerParams(
            dimension_semantics=("parallel",),
            vmem_limit_bytes=vmem_limit,
        ),
        cost_estimate=cost,
    )(x2d, w1p, b1p, w2p, b2p)

    return out2d[:M, :N].reshape(B, S, N).astype(x.dtype)


def _reference(x, w1, b1, w2, b2):
    h = jnp.einsum("bsk,kh->bsh", x, w1) + b1
    h = 0.5 * h * (1.0 + lax.erf(h / math.sqrt(2.0)))
    return jnp.einsum("bsh,hn->bsn", h, w2) + b2


if __name__ == "__main__":
    # Small shapes consistent with the module: tokens of dim input_size.
    batch, seq = 2, 8
    input_size, hidden_size, output_size = 32, 64, 32

    key = jax.random.PRNGKey(0)
    kx, k1, k2, k3, k4 = jax.random.split(key, 5)

    x = jax.random.normal(kx, (batch, seq, input_size), dtype=jnp.float32)

    # Deterministic parameter init (uniform, roughly like PyTorch Linear init).
    lim1 = 1.0 / math.sqrt(input_size)
    lim2 = 1.0 / math.sqrt(hidden_size)
    w1 = jax.random.uniform(k1, (input_size, hidden_size), jnp.float32, -lim1, lim1)
    b1 = jax.random.uniform(k2, (hidden_size,), jnp.float32, -lim1, lim1)
    w2 = jax.random.uniform(k3, (hidden_size, output_size), jnp.float32, -lim2, lim2)
    b2 = jax.random.uniform(k4, (output_size,), jnp.float32, -lim2, lim2)

    out = vit_ffc_forward(x, w1, b1, w2, b2)
    out = jax.block_until_ready(out)

    ref = _reference(x, w1, b1, w2, b2)
    assert out.shape == (batch, seq, output_size)
    # bf16 MXU inputs with f32 accumulation -> loosened tolerance vs pure-f32 ref.
    assert jnp.allclose(out, ref, atol=2e-2, rtol=2e-2), float(
        jnp.max(jnp.abs(out - ref)))

    print("KERNEL_OK")
</pallas_src>

<mosaic_0001>
module attributes {stable_mosaic.version = 11 : i64} {
  func.func @_ffc_kernel(%arg0: i32, %arg1: memref<16x128xbf16, #tpu.memory_space<vmem>>, %arg2: memref<128x128xbf16, #tpu.memory_space<vmem>>, %arg3: memref<1x128xf32, #tpu.memory_space<vmem>>, %arg4: memref<128x128xbf16, #tpu.memory_space<vmem>>, %arg5: memref<1x128xf32, #tpu.memory_space<vmem>>, %arg6: memref<16x128xf32, #tpu.memory_space<vmem>>) attributes {dimension_semantics = [#tpu.dimension_semantics<parallel>], iteration_bounds = array<i64: 1>, scalar_prefetch = 0 : i64, scratch_operands = 0 : i64, tpu.core_type = #tpu.core_type<tc>, window_params = [{transform_indices = @transform_0, window_bounds = array<i64: 16, 128>}, {pipeline_mode = #tpu.pipeline_mode<synchronous>, transform_indices = @transform_1, window_bounds = array<i64: 128, 128>}, {pipeline_mode = #tpu.pipeline_mode<synchronous>, transform_indices = @transform_2, window_bounds = array<i64: 1, 128>}, {pipeline_mode = #tpu.pipeline_mode<synchronous>, transform_indices = @transform_3, window_bounds = array<i64: 128, 128>}, {pipeline_mode = #tpu.pipeline_mode<synchronous>, transform_indices = @transform_4, window_bounds = array<i64: 1, 128>}, {transform_indices = @transform_5, window_bounds = array<i64: 16, 128>}]} {
    %c0 = arith.constant 0 : index
    %c0_0 = arith.constant 0 : index
    %0 = vector.load %arg1[%c0, %c0_0] : memref<16x128xbf16, #tpu.memory_space<vmem>>, vector<16x128xbf16>
    %c0_1 = arith.constant 0 : index
    %c0_2 = arith.constant 0 : index
    %1 = vector.load %arg2[%c0_1, %c0_2] : memref<128x128xbf16, #tpu.memory_space<vmem>>, vector<128x128xbf16>
    %cst = arith.constant dense<0.000000e+00> : vector<16x128xf32>
    %2 = tpu.matmul %0, %1, %cst {dimension_numbers = #tpu.dot_dimension_numbers<[1], [0], [0], [1], [0, 0, 1, 1], [], []>} : vector<16x128xbf16>, vector<128x128xbf16>, vector<16x128xf32> -> vector<16x128xf32>
    %c0_3 = arith.constant 0 : index
    %c0_4 = arith.constant 0 : index
    %3 = vector.load %arg3[%c0_3, %c0_4] : memref<1x128xf32, #tpu.memory_space<vmem>>, vector<1x128xf32>
    %4 = vector.broadcast %3 : vector<1x128xf32> to vector<16x128xf32>
    %5 = arith.addf %2, %4 : vector<16x128xf32>
    %cst_5 = arith.constant 5.000000e-01 : f32
    %6 = vector.broadcast %cst_5 : f32 to vector<16x128xf32>
    %7 = arith.mulf %6, %5 : vector<16x128xf32>
    %cst_6 = arith.constant 0.707106769 : f32
    %8 = vector.broadcast %cst_6 : f32 to vector<16x128xf32>
    %9 = arith.mulf %5, %8 : vector<16x128xf32>
    %10 = math.erf %9 : vector<16x128xf32>
    %cst_7 = arith.constant 1.000000e+00 : f32
    %11 = vector.broadcast %cst_7 : f32 to vector<16x128xf32>
    %12 = arith.addf %11, %10 : vector<16x128xf32>
    %13 = arith.mulf %7, %12 : vector<16x128xf32>
    %14 = arith.truncf %13 : vector<16x128xf32> to vector<16x128xbf16>
    %c0_8 = arith.constant 0 : index
    %c0_9 = arith.constant 0 : index
    %15 = vector.load %arg4[%c0_8, %c0_9] : memref<128x128xbf16, #tpu.memory_space<vmem>>, vector<128x128xbf16>
    %cst_10 = arith.constant dense<0.000000e+00> : vector<16x128xf32>
    %16 = tpu.matmul %14, %15, %cst_10 {dimension_numbers = #tpu.dot_dimension_numbers<[1], [0], [0], [1], [0, 0, 1, 1], [], []>} : vector<16x128xbf16>, vector<128x128xbf16>, vector<16x128xf32> -> vector<16x128xf32>
    %c0_11 = arith.constant 0 : index
    %c0_12 = arith.constant 0 : index
    %17 = vector.load %arg5[%c0_11, %c0_12] : memref<1x128xf32, #tpu.memory_space<vmem>>, vector<1x128xf32>
    %18 = vector.broadcast %17 : vector<1x128xf32> to vector<16x128xf32>
    %19 = arith.addf %16, %18 : vector<16x128xf32>
    %c0_13 = arith.constant 0 : index
    %c0_14 = arith.constant 0 : index
    %20 = vector.load %arg6[%c0_13, %c0_14] : memref<16x128xf32, #tpu.memory_space<vmem>>, vector<16x128xf32>
    tpu.vector_store %arg6[%c0_13, %c0_14], %19 {strides = array<i32>} : memref<16x128xf32, #tpu.memory_space<vmem>>, vector<16x128xf32>,
    return
  }
  func.func @transform_0(%arg0: i32) -> (i32, i32) {
    %c0_i32 = arith.constant 0 : i32
    %c0_i32_0 = arith.constant 0 : i32
    return %arg0, %c0_i32 : i32, i32
  }
  func.func @transform_1(%arg0: i32) -> (i32, i32) {
    %c0_i32 = arith.constant 0 : i32
    %c0_i32_0 = arith.constant 0 : i32
    %c0_i32_1 = arith.constant 0 : i32
    return %c0_i32, %c0_i32_0 : i32, i32
  }
  func.func @transform_2(%arg0: i32) -> (i32, i32) {
    %c0_i32 = arith.constant 0 : i32
    %c0_i32_0 = arith.constant 0 : i32
    %c0_i32_1 = arith.constant 0 : i32
    return %c0_i32, %c0_i32_0 : i32, i32
  }
  func.func @transform_3(%arg0: i32) -> (i32, i32) {
    %c0_i32 = arith.constant 0 : i32
    %c0_i32_0 = arith.constant 0 : i32
    %c0_i32_1 = arith.constant 0 : i32
    return %c0_i32, %c0_i32_0 : i32, i32
  }
  func.func @transform_4(%arg0: i32) -> (i32, i32) {
    %c0_i32 = arith.constant 0 : i32
    %c0_i32_0 = arith.constant 0 : i32
    %c0_i32_1 = arith.constant 0 : i32
    return %c0_i32, %c0_i32_0 : i32, i32
  }
  func.func @transform_5(%arg0: i32) -> (i32, i32) {
    %c0_i32 = arith.constant 0 : i32
    %c0_i32_0 = arith.constant 0 : i32
    return %arg0, %c0_i32 : i32, i32
  }
}

</mosaic_0001>

<bundles_post_ra>
// kernel: vit_ffc_forward.1
= control target key start
LH: loop header
LB: loop body
LE: loop exit
PB: predicated region body
PF: predicated region fallthrough
CT: control target
= control target key end

     0   :  { %v370_v0 = vmov 0.0   ;;  %vm371_vm0 = vmmov 0   ;;  %s465_s1 = inlined_call_operand.vmem [shape: bf16[128,128], index: 1, kind: input, shape index: {}]   ;;  %s466_s3 = inlined_call_operand.vmem [shape: bf16[128,128], index: 3, kind: input, shape index: {}]   ;;  %s467_s0 = inlined_call_operand.vmem [shape: bf16[16,128], index: 0, kind: input, shape index: {}]   ;;  %s468_s2 = inlined_call_operand.vmem [shape: f32[1,128], index: 2, kind: input, shape index: {}]   ;;  %s469_s4 = inlined_call_operand.vmem [shape: f32[1,128], index: 4, kind: input, shape index: {}]   ;;  %s470_s5 = inlined_call_operand.vmem [shape: f32[16,128], index: 5, kind: output, shape index: {}]  }
   0x1   :  { %307 = vmatprep.subr.bf16.mxu0 %v370_v0  ;;  %v349_v1 = vld [vmem:[%s465_s1] sm:$0xff]   ;;  %323 = vmatprep.mubr.msk.bf16.mxu0 %vm371_vm0, %v370_v0  ;;  %v350_v2 = vld [vmem:[%s465_s1 + $0x8] sm:$0xff]   ;;  %v351_v3 = vld [vmem:[%s465_s1 + $0x10] sm:$0xff]  }
   0x2   :  { %327 = vmatprep.subr.bf16.mxu1 %v370_v0  ;;  %343 = vmatprep.mubr.msk.bf16.mxu1 %vm371_vm0, %v370_v0  ;;  %v358_v4 = vld [vmem:[%s466_s3] sm:$0xff]   ;;  %v352_v5 = vld [vmem:[%s465_s1 + $0x18] sm:$0xff]   ;;  %v359_v6 = vld [vmem:[%s466_s3 + $0x8] sm:$0xff]  }
   0x3   :  { %308 = vmatpush3.bf16.msra.mxu0 %v349_v1  ;;  %328 = vmatpush3.bf16.msra.mxu1 %v358_v4  ;;  %v353_v7 = vld [vmem:[%s465_s1 + $0x20] sm:$0xff]   ;;  %v354_v8 = vld [vmem:[%s465_s1 + $0x28] sm:$0xff]   ;;  %v355_v9 = vld [vmem:[%s465_s1 + $0x30] sm:$0xff]  }
   0x4   :  { %309 = vmatprep.subr.bf16.mxu0 %v370_v0  ;;  %329 = vmatprep.subr.bf16.mxu1 %v370_v0  ;;  %v356_v10 = vld [vmem:[%s465_s1 + $0x38] sm:$0xff]   ;;  %v357_v11 = vld [vmem:[%s467_s0] sm:$0xff]   ;;  %v360_v12 = vld [vmem:[%s466_s3 + $0x10] sm:$0xff]  }
   0x5   :  { %v361_v13 = vld [vmem:[%s466_s3 + $0x18] sm:$0xff]   ;;  %v362_v14 = vld [vmem:[%s466_s3 + $0x20] sm:$0xff]   ;;  %v363_v15 = vld [vmem:[%s466_s3 + $0x28] sm:$0xff]  }
   0x6   :  { %v364_v16 = vld [vmem:[%s466_s3 + $0x30] sm:$0xff]   ;;  %v365_v17 = vld [vmem:[%s466_s3 + $0x38] sm:$0xff]   ;;  %v270_v18 = vld [vmem:[%s468_s2] ss:$0 sm:$0xff] }
   0x7   :  { %310 = vmatpush3.bf16.msra.mxu0 %v350_v2  ;;  %330 = vmatpush3.bf16.msra.mxu1 %v359_v6  ;;  %v280_v36 = vld [vmem:[%s469_s4] ss:$0 sm:$0xff] }
   0x8   :  { %311 = vmatprep.subr.bf16.mxu0 %v370_v0  ;;  %331 = vmatprep.subr.bf16.mxu1 %v370_v0 }
   0xb   :  { %312 = vmatpush3.bf16.msra.mxu0 %v351_v3  ;;  %332 = vmatpush3.bf16.msra.mxu1 %v360_v12 }
   0xc   :  { %313 = vmatprep.subr.bf16.mxu0 %v370_v0  ;;  %333 = vmatprep.subr.bf16.mxu1 %v370_v0 }
   0xf   :  { %314 = vmatpush3.bf16.msra.mxu0 %v352_v5  ;;  %334 = vmatpush3.bf16.msra.mxu1 %v361_v13 }
  0x10   :  { %315 = vmatprep.subr.bf16.mxu0 %v370_v0  ;;  %335 = vmatprep.subr.bf16.mxu1 %v370_v0 }
  0x13   :  { %316 = vmatpush3.bf16.msra.mxu0 %v353_v7  ;;  %336 = vmatpush3.bf16.msra.mxu1 %v362_v14 }
  0x14   :  { %317 = vmatprep.subr.bf16.mxu0 %v370_v0  ;;  %337 = vmatprep.subr.bf16.mxu1 %v370_v0 }
  0x17   :  { %318 = vmatpush3.bf16.msra.mxu0 %v354_v8  ;;  %338 = vmatpush3.bf16.msra.mxu1 %v363_v15 }
  0x18   :  { %319 = vmatprep.subr.bf16.mxu0 %v370_v0  ;;  %339 = vmatprep.subr.bf16.mxu1 %v370_v0 }
  0x1b   :  { %320 = vmatpush3.bf16.msra.mxu0 %v355_v9  ;;  %340 = vmatpush3.bf16.msra.mxu1 %v364_v16 }
  0x1c   :  { %321 = vmatprep.subr.bf16.mxu0 %v370_v0  ;;  %341 = vmatprep.subr.bf16.mxu1 %v370_v0 }
  0x1f   :  { %322 = vmatpush3.bf16.msra.mxu0 %v356_v10  ;;  %342 = vmatpush3.bf16.msra.mxu1 %v365_v17 }
  0x22   :  { %324 = vmatmul.mubr.bf16.vlgmr.msra.gmra.mrb[0].mxu0 %v357_v11 }
  0xf5   :  { %v134_v19 = vpop.f32.mrb[0].mxu0 }
  0xf6   :  { %v135_v20 = vadd.f32 %v270_v18, %v134_v19  ;;  %v325_v21 = vpop.f32.mrb[1].mxu0 }
  0xf7   :  { %v137_v22 = vpop.f32.mrb[2].mxu0 }
  0xf8   :  { %v143_v23 = vmul.f32 0.70710677, %v135_v20  ;;  %v138_v24 = vadd.f32 %v270_v18, %v137_v22  ;;  %v326_v25 = vpop.f32.mrb[3].mxu0  ;;  %v141_v30 = vmul.f32 0.5, %v135_v20 }
  0xfa   :  { %366 = verf.f32 %v143_v23  ;;  %v144_v26 = vmul.f32 0.70710677, %v138_v24  ;;  %v142_v31 = vmul.f32 0.5, %v138_v24 }
  0xfc   :  { %368 = verf.f32 %v144_v26 }
 0x104   :  { %v367_v27 = vpop.eup %366 }
 0x105   :  { %v147_v28 = vadd.f32 1.0, %v367_v27 }
 0x106   :  { %v369_v29 = vpop.eup %368 }
 0x107   :  { %v148_v32 = vadd.f32 1.0, %v369_v29  ;;  %v149_v33 = vmul.f32 %v147_v28, %v141_v30 }
 0x109   :  { %v150_v34 = vmul.f32 %v148_v32, %v142_v31 }
 0x10b   :  { %v151_v35 = vpack.c.bf16 %v150_v34, %v149_v33 }
 0x10d   :  { %344 = vmatmul.mubr.bf16.vlgmr.msra.gmra.mrb[0].mxu1 %v151_v35 }
 0x1e0   :  { %v257_v37 = vpop.f32.mrb[0].mxu1 }
 0x1e1   :  { %v258_v38 = vadd.f32 %v280_v36, %v257_v37  ;;  %v345_v39 = vpop.f32.mrb[1].mxu1 }
 0x1e2   :  { %v260_v40 = vpop.f32.mrb[2].mxu1 }
 0x1e3   :  { %264 = vst [vmem:[%s470_s5] sm:$0xff] %v258_v38  ;;  %v261_v41 = vadd.f32 %v280_v36, %v260_v40  ;;  %v346_v42 = vpop.f32.mrb[3].mxu1 }
 0x1e5   :  { %265 = vst [vmem:[%s470_s5 + $0x8] sm:$0xff] %v261_v41 }

</bundles_post_ra>
